<compile_context>
chip_gen: v7x
topology: tpu7x:2x2x1
jax: 0.10.0
libtpu: 0.0.40
codegen_flags: <defaults>
</compile_context>

<pallas_src>
import functools

import jax
import jax.numpy as jnp
from jax.experimental import pallas as pl
from jax.experimental.pallas import tpu as pltpu


def _block_kernel(x_ref, gmat_ref, gscale_ref, beta_ref, w_ref, bias_ref, o_ref,
                  *, groups, eps, matmul_dtype):
    # x_ref:     (Nb, H, W*C)      packed NHWC activations (lane axis = (w, c))
    # gmat:      (W*C, G)          packed-lane -> group one-hot membership
    # gscale:    (G, W*C)          membership^T pre-scaled by gamma (per lane)
    # beta:      (1, W*C)          GroupNorm shift, tiled over w
    # w_ref:     (3, W*C, W*Cout)  per-dy width-Toeplitz conv weights (W padding folded in)
    # bias:      (1, W*Cout)       conv bias, tiled over w
    # o_ref:     (Nb, H, W*Cout)   lane-dense output slab
    Nb, H, WC = x_ref.shape
    WCo = o_ref.shape[2]

    x = x_ref[...].astype(jnp.float32)                       # (Nb, H, WC), f32 math

    # ---- GroupNorm statistics: merged (2*Nb, WC) x (WC, G) matmul.
    # NOTE: single-pass E[x^2]-E[x]^2 in f32; use a two-pass/Welford form if
    # activations can have |mean| >> std.
    s = jnp.sum(x, axis=1)                                   # (Nb, WC)
    ss = jnp.sum(x * x, axis=1)                              # (Nb, WC)
    red = jnp.dot(jnp.concatenate([s, ss], axis=0), gmat_ref[...],
                  preferred_element_type=jnp.float32)        # (2*Nb, G)
    inv_n = 1.0 / float(H * WC // groups)                    # 1 / (H * W * C/G)
    mean_g = red[0:Nb] * inv_n                               # (Nb, G)
    var_g = red[Nb:2 * Nb] * inv_n - mean_g * mean_g         # biased variance
    scale_g = jax.lax.rsqrt(var_g + eps)                     # (Nb, G)

    # Broadcast per-group [scale, mean*scale] back to packed lanes with one
    # (2*Nb, G) x (G, WC) matmul; gamma is pre-folded into gscale_ref (feedback #6).
    bc = jnp.dot(jnp.concatenate([scale_g, mean_g * scale_g], axis=0),
                 gscale_ref[...], preferred_element_type=jnp.float32)   # (2*Nb, WC)
    a_c = bc[0:Nb][:, None, :]                               # gamma * rsqrt(var)
    b_c = (beta_ref[...] - bc[Nb:2 * Nb])[:, None, :]        # beta - gamma*mean*rsqrt(var)

    # GroupNorm + affine folded to one multiply-add; Swish in f32 (EUP sigmoid).
    h = x * a_c + b_c                                        # (Nb, H, WC)
    h = h * jax.nn.sigmoid(h)                                # Dropout(p=0) == identity

    # ---- Conv 3x3, padding=1: three K=WC matmuls over row-shifted views of h
    # (no (Nb, H, 3*WC) concat; shifted copies are in the matmul dtype).
    hm = h.astype(matmul_dtype)                              # center tap operand
    zrow = jnp.zeros((Nb, 1, WC), matmul_dtype)
    top = jnp.concatenate([zrow, hm[:, :H - 1]], axis=1)     # in[y-1] (zero at y=0)
    bot = jnp.concatenate([hm[:, 1:], zrow], axis=1)         # in[y+1] (zero at y=H-1)

    M = Nb * H
    acc = jnp.dot(hm.reshape(M, WC), w_ref[1],
                  preferred_element_type=jnp.float32)        # dy = 1 (center row)
    acc += jnp.dot(top.reshape(M, WC), w_ref[0],
                   preferred_element_type=jnp.float32)       # dy = 0
    acc += jnp.dot(bot.reshape(M, WC), w_ref[2],
                   preferred_element_type=jnp.float32)       # dy = 2
    # TODO(synk): fold bias into the matmul (ones column) to save one VPU pass.
    acc += bias_ref[...]
    o_ref[...] = acc.reshape(Nb, H, WCo).astype(o_ref.dtype)  # lane-dense store


def _pick_batch_block(N, H, *, target_m=256, min_grid=2):
    """Pick Nb so Nb*H approaches the MXU width while keeping >= min_grid steps."""
    divisors = [d for d in range(1, N + 1) if N % d == 0]
    ok = [d for d in divisors if d * H >= target_m and N // d >= min_grid]
    if ok:
        return min(ok)
    ok = [d for d in divisors if N // d >= min_grid]
    if ok:
        return max(ok)
    return N


def block_forward(x_nchw, gamma, beta, weight_oihw, bias, *, groups, eps=1e-5,
                  batch_block=None, matmul_dtype=jnp.bfloat16, act_dtype=None):
    """Equivalent of Block.forward. x_nchw: (N, C, H, W)."""
    N, C, H, W = x_nchw.shape
    Cout = weight_oihw.shape[0]
    if C % groups != 0:
        raise ValueError(f"groups={groups} must divide C={C}")
    if batch_block is None:
        Nb = _pick_batch_block(N, H)
    else:
        if batch_block <= 0 or N % batch_block != 0:
            raise ValueError(f"batch_block={batch_block} must divide N={N}")
        Nb = batch_block
    WC = W * C
    WCo = W * Cout
    cg = C // groups
    if act_dtype is None:
        act_dtype = (jnp.bfloat16 if jnp.dtype(matmul_dtype) == jnp.dtype(jnp.bfloat16)
                     else x_nchw.dtype)

    # ---- pack activations: NCHW -> NHWC -> (N, H, W*C); bf16 from HBM (feedback #7).
    # TODO(synk): transposes stay because the public API mirrors the PyTorch NCHW module.
    x_packed = jnp.transpose(x_nchw, (0, 2, 3, 1)).reshape(N, H, WC).astype(act_dtype)

    # ---- packed GroupNorm parameters / membership matrices (gamma folded into gscale).
    ch = jnp.tile(jnp.arange(C), W)                                   # channel per packed lane
    gmat = (ch[:, None] // cg == jnp.arange(groups)[None, :]).astype(jnp.float32)  # (WC, G)
    gamma_p = jnp.tile(gamma.astype(jnp.float32), W)                  # (WC,)
    gscale = jnp.transpose(gmat) * gamma_p[None, :]                   # (G, WC)
    beta_p = jnp.tile(beta.astype(jnp.float32), W).reshape(1, WC)
    bias_p = jnp.tile(bias.astype(jnp.float32), W).reshape(1, WCo)

    # ---- per-dy width-Toeplitz conv weights: w_taps[dy, u*C+ci, w*Cout+co]
    #      = weight[co, ci, dy, u - w + 1] when the tap is in range, else 0.
    w_t = jnp.transpose(weight_oihw, (2, 3, 1, 0)).astype(jnp.float32)  # (3,3,Cin,Cout)
    u = jnp.arange(W)
    dx = u[:, None] - u[None, :] + 1                                    # (u, w)
    valid = ((dx >= 0) & (dx <= 2)).astype(jnp.float32)
    dxc = jnp.clip(dx, 0, 2)
    t = w_t[:, dxc] * valid[None, :, :, None, None]                     # (3, u, w, Cin, Cout)
    t = jnp.transpose(t, (0, 1, 3, 2, 4))                               # (3, u, Cin, w, Cout)
    w_taps = t.reshape(3, WC, WCo).astype(matmul_dtype)
    # TODO(synk): switch to im2col + Cout grid axis once C >= ~64 (see header note).

    # ---- VMEM budget: compute the actual requirement, clamp below v7x's 64 MiB.
    act_b = jnp.dtype(act_dtype).itemsize
    mat_b = jnp.dtype(matmul_dtype).itemsize
    out_b = jnp.dtype(x_nchw.dtype).itemsize
    est = (2 * Nb * H * WC * act_b                       # x block (double buffered)
           + 2 * Nb * H * WCo * out_b                    # out block (double buffered)
           + 2 * 3 * WC * WCo * mat_b                    # conv taps (grid-invariant)
           + 2 * (2 * WC * groups + WC + WCo) * 4        # small constants
           + Nb * H * (4 * WC * 4 + 3 * WC * mat_b + 2 * WCo * 4))  # in-kernel temporaries
    vmem_limit = int(min(48 * 1024 * 1024, max(16 * 1024 * 1024, 2 * est)))

    kernel = functools.partial(_block_kernel, groups=groups, eps=eps,
                               matmul_dtype=matmul_dtype)

    out_packed = pl.pallas_call(
        kernel,
        out_shape=jax.ShapeDtypeStruct((N, H, WCo), x_nchw.dtype),
        grid_spec=pltpu.PrefetchScalarGridSpec(
            num_scalar_prefetch=0,
            grid=(N // Nb,),
            in_specs=[
                pl.BlockSpec((Nb, H, WC), lambda n: (n, 0, 0)),      # x
                pl.BlockSpec((WC, groups), lambda n: (0, 0)),        # group membership
                pl.BlockSpec((groups, WC), lambda n: (0, 0)),        # membership^T * gamma
                pl.BlockSpec((1, WC), lambda n: (0, 0)),             # beta
                pl.BlockSpec((3, WC, WCo), lambda n: (0, 0, 0)),     # conv taps
                pl.BlockSpec((1, WCo), lambda n: (0, 0)),            # conv bias
            ],
            out_specs=pl.BlockSpec((Nb, H, WCo), lambda n: (n, 0, 0)),
        ),
        compiler_params=pltpu.CompilerParams(
            dimension_semantics=("parallel",),           # independent batch blocks
            vmem_limit_bytes=vmem_limit),
    )(x_packed, gmat, gscale, beta_p, w_taps, bias_p)

    out = out_packed.reshape(N, H, W, Cout)
    return jnp.transpose(out, (0, 3, 1, 2))                             # back to NCHW


def block_reference(x, gamma, beta, w, b, *, groups, eps=1e-5):
    """Pure-JAX reference mirroring the PyTorch module (NCHW)."""
    N, C, H, W = x.shape
    xg = x.reshape(N, groups, C // groups, H, W)
    mean = xg.mean(axis=(2, 3, 4), keepdims=True)
    var = ((xg - mean) ** 2).mean(axis=(2, 3, 4), keepdims=True)
    xn = ((xg - mean) / jnp.sqrt(var + eps)).reshape(N, C, H, W)
    h = xn * gamma[None, :, None, None] + beta[None, :, None, None]
    h = h * jax.nn.sigmoid(h)
    out = jax.lax.conv_general_dilated(
        h, w, window_strides=(1, 1), padding=((1, 1), (1, 1)),
        dimension_numbers=("NCHW", "OIHW", "NCHW"))
    return out + b[None, :, None, None]


if __name__ == "__main__":
    # Small shapes consistent with the module: Block(dim=8, dim_out=16, groups=4).
    N, C, H, W = 8, 8, 16, 16
    Cout, GROUPS = 16, 4

    key = jax.random.PRNGKey(0)
    kx, kg, kb, kw, kbias = jax.random.split(key, 5)

    x = jax.random.normal(kx, (N, C, H, W), dtype=jnp.float32)
    gamma = 1.0 + 0.1 * jax.random.normal(kg, (C,), dtype=jnp.float32)
    beta = 0.1 * jax.random.normal(kb, (C,), dtype=jnp.float32)
    fan_in = C * 3 * 3
    weight = jax.random.normal(kw, (Cout, C, 3, 3), dtype=jnp.float32) / jnp.sqrt(fan_in)
    bias = 0.1 * jax.random.normal(kbias, (Cout,), dtype=jnp.float32)

    ref = block_reference(x, gamma, beta, weight, bias, groups=GROUPS)

    # f32 path (tight tolerance).
    out_f32 = block_forward(x, gamma, beta, weight, bias, groups=GROUPS,
                            matmul_dtype=jnp.float32)
    out_f32 = jax.block_until_ready(out_f32)
    assert out_f32.shape == (N, Cout, H, W)
    assert jnp.allclose(out_f32, ref, rtol=1e-4, atol=1e-4), (
        float(jnp.max(jnp.abs(out_f32 - ref))))

    # bf16 activations + bf16 matmul operands, f32 accumulation (MXU-native path).
    out_bf16 = block_forward(x, gamma, beta, weight, bias, groups=GROUPS,
                             matmul_dtype=jnp.bfloat16)
    out_bf16 = jax.block_until_ready(out_bf16)
    assert jnp.allclose(out_bf16, ref, rtol=3e-2, atol=3e-2), (
        float(jnp.max(jnp.abs(out_bf16 - ref))))

    print("KERNEL_OK")
</pallas_src>

<mosaic_0001>
module attributes {stable_mosaic.version = 11 : i64} {
  func.func @_block_kernel(%arg0: i32, %arg1: memref<4x16x128xf32, #tpu.memory_space<vmem>>, %arg2: memref<128x4xf32, #tpu.memory_space<vmem>>, %arg3: memref<4x128xf32, #tpu.memory_space<vmem>>, %arg4: memref<1x128xf32, #tpu.memory_space<vmem>>, %arg5: memref<3x128x256xf32, #tpu.memory_space<vmem>>, %arg6: memref<1x256xf32, #tpu.memory_space<vmem>>, %arg7: memref<4x16x256xf32, #tpu.memory_space<vmem>>) attributes {dimension_semantics = [#tpu.dimension_semantics<parallel>], iteration_bounds = array<i64: 2>, scalar_prefetch = 0 : i64, scratch_operands = 0 : i64, tpu.core_type = #tpu.core_type<tc>, window_params = [{transform_indices = @transform_0, window_bounds = array<i64: 4, 16, 128>}, {pipeline_mode = #tpu.pipeline_mode<synchronous>, transform_indices = @transform_1, window_bounds = array<i64: 128, 4>}, {pipeline_mode = #tpu.pipeline_mode<synchronous>, transform_indices = @transform_2, window_bounds = array<i64: 4, 128>}, {pipeline_mode = #tpu.pipeline_mode<synchronous>, transform_indices = @transform_3, window_bounds = array<i64: 1, 128>}, {pipeline_mode = #tpu.pipeline_mode<synchronous>, transform_indices = @transform_4, window_bounds = array<i64: 3, 128, 256>}, {pipeline_mode = #tpu.pipeline_mode<synchronous>, transform_indices = @transform_5, window_bounds = array<i64: 1, 256>}, {transform_indices = @transform_6, window_bounds = array<i64: 4, 16, 256>}]} {
    %c0 = arith.constant 0 : index
    %c0_0 = arith.constant 0 : index
    %c0_1 = arith.constant 0 : index
    %0 = vector.load %arg1[%c0, %c0_0, %c0_1] : memref<4x16x128xf32, #tpu.memory_space<vmem>>, vector<4x16x128xf32>
    %cst = arith.constant dense<0.000000e+00> : vector<4x128xf32>
    %1 = vector.multi_reduction <add>, %0, %cst [1] : vector<4x16x128xf32> to vector<4x128xf32>
    %2 = arith.mulf %0, %0 : vector<4x16x128xf32>
    %cst_2 = arith.constant dense<0.000000e+00> : vector<4x128xf32>
    %3 = vector.multi_reduction <add>, %2, %cst_2 [1] : vector<4x16x128xf32> to vector<4x128xf32>
    %4 = tpu.concatenate %1, %3 in 0 : vector<4x128xf32>, vector<4x128xf32> -> vector<8x128xf32>
    %c0_3 = arith.constant 0 : index
    %c0_4 = arith.constant 0 : index
    %5 = vector.load %arg2[%c0_3, %c0_4] : memref<128x4xf32, #tpu.memory_space<vmem>>, vector<128x4xf32>
    %cst_5 = arith.constant dense<0.000000e+00> : vector<8x4xf32>
    %6 = tpu.matmul %4, %5, %cst_5 {dimension_numbers = #tpu.dot_dimension_numbers<[1], [0], [0], [1], [0, 0, 1, 1], [], []>} : vector<8x128xf32>, vector<128x4xf32>, vector<8x4xf32> -> vector<8x4xf32>
    %7 = vector.extract_strided_slice %6 {offsets = [0, 0], sizes = [4, 4], strides = [1, 1]} : vector<8x4xf32> to vector<4x4xf32>
    %cst_6 = arith.constant 0.001953125 : f32
    %8 = vector.broadcast %cst_6 : f32 to vector<4x4xf32>
    %9 = arith.mulf %7, %8 : vector<4x4xf32>
    %10 = vector.extract_strided_slice %6 {offsets = [4, 0], sizes = [4, 4], strides = [1, 1]} : vector<8x4xf32> to vector<4x4xf32>
    %cst_7 = arith.constant 0.001953125 : f32
    %11 = vector.broadcast %cst_7 : f32 to vector<4x4xf32>
    %12 = arith.mulf %10, %11 : vector<4x4xf32>
    %13 = arith.mulf %9, %9 : vector<4x4xf32>
    %14 = arith.subf %12, %13 : vector<4x4xf32>
    %cst_8 = arith.constant 9.99999974E-6 : f32
    %15 = vector.broadcast %cst_8 : f32 to vector<4x4xf32>
    %16 = arith.addf %14, %15 : vector<4x4xf32>
    %17 = math.rsqrt %16 : vector<4x4xf32>
    %18 = arith.mulf %9, %17 : vector<4x4xf32>
    %19 = tpu.concatenate %17, %18 in 0 : vector<4x4xf32>, vector<4x4xf32> -> vector<8x4xf32>
    %c0_9 = arith.constant 0 : index
    %c0_10 = arith.constant 0 : index
    %20 = vector.load %arg3[%c0_9, %c0_10] : memref<4x128xf32, #tpu.memory_space<vmem>>, vector<4x128xf32>
    %cst_11 = arith.constant dense<0.000000e+00> : vector<8x128xf32>
    %21 = tpu.matmul %19, %20, %cst_11 {dimension_numbers = #tpu.dot_dimension_numbers<[1], [0], [0], [1], [0, 0, 1, 1], [], []>} : vector<8x4xf32>, vector<4x128xf32>, vector<8x128xf32> -> vector<8x128xf32>
    %22 = vector.extract_strided_slice %21 {offsets = [0, 0], sizes = [4, 128], strides = [1, 1]} : vector<8x128xf32> to vector<4x128xf32>
    %23 = vector.shape_cast %22 : vector<4x128xf32> to vector<4x1x128xf32>
    %c0_12 = arith.constant 0 : index
    %c0_13 = arith.constant 0 : index
    %24 = vector.load %arg4[%c0_12, %c0_13] : memref<1x128xf32, #tpu.memory_space<vmem>>, vector<1x128xf32>
    %25 = vector.extract_strided_slice %21 {offsets = [4, 0], sizes = [4, 128], strides = [1, 1]} : vector<8x128xf32> to vector<4x128xf32>
    %26 = vector.broadcast %24 : vector<1x128xf32> to vector<4x128xf32>
    %27 = arith.subf %26, %25 : vector<4x128xf32>
    %28 = vector.shape_cast %27 : vector<4x128xf32> to vector<4x1x128xf32>
    %29 = vector.broadcast %23 : vector<4x1x128xf32> to vector<4x16x128xf32>
    %30 = arith.mulf %0, %29 : vector<4x16x128xf32>
    %31 = vector.broadcast %28 : vector<4x1x128xf32> to vector<4x16x128xf32>
    %32 = arith.addf %30, %31 : vector<4x16x128xf32>
    %33 = arith.negf %32 : vector<4x16x128xf32>
    %34 = math.exp %33 : vector<4x16x128xf32>
    %cst_14 = arith.constant 1.000000e+00 : f32
    %35 = vector.broadcast %cst_14 : f32 to vector<4x16x128xf32>
    %36 = arith.addf %35, %34 : vector<4x16x128xf32>
    %37 = arith.divf %35, %36 : vector<4x16x128xf32>
    %38 = arith.mulf %32, %37 : vector<4x16x128xf32>
    %cst_15 = arith.constant 0.000000e+00 : f32
    %39 = vector.broadcast %cst_15 : f32 to vector<4x1x128xf32>
    %40 = vector.extract_strided_slice %38 {offsets = [0, 0, 0], sizes = [4, 15, 128], strides = [1, 1, 1]} : vector<4x16x128xf32> to vector<4x15x128xf32>
    %41 = tpu.concatenate %39, %40 in 1 : vector<4x1x128xf32>, vector<4x15x128xf32> -> vector<4x16x128xf32>
    %42 = vector.extract_strided_slice %38 {offsets = [0, 1, 0], sizes = [4, 15, 128], strides = [1, 1, 1]} : vector<4x16x128xf32> to vector<4x15x128xf32>
    %43 = tpu.concatenate %42, %39 in 1 : vector<4x15x128xf32>, vector<4x1x128xf32> -> vector<4x16x128xf32>
    %44 = vector.shape_cast %38 : vector<4x16x128xf32> to vector<64x128xf32>
    %c1 = arith.constant 1 : index
    %c0_16 = arith.constant 0 : index
    %c0_17 = arith.constant 0 : index
    %45 = vector.load %arg5[%c1, %c0_16, %c0_17] : memref<3x128x256xf32, #tpu.memory_space<vmem>>, vector<1x128x256xf32>
    %46 = vector.shape_cast %45 : vector<1x128x256xf32> to vector<128x256xf32>
    %cst_18 = arith.constant dense<0.000000e+00> : vector<64x256xf32>
    %47 = tpu.matmul %44, %46, %cst_18 {dimension_numbers = #tpu.dot_dimension_numbers<[1], [0], [0], [1], [0, 0, 1, 1], [], []>} : vector<64x128xf32>, vector<128x256xf32>, vector<64x256xf32> -> vector<64x256xf32>
    %48 = vector.shape_cast %41 : vector<4x16x128xf32> to vector<64x128xf32>
    %c0_19 = arith.constant 0 : index
    %c0_20 = arith.constant 0 : index
    %c0_21 = arith.constant 0 : index
    %49 = vector.load %arg5[%c0_19, %c0_20, %c0_21] : memref<3x128x256xf32, #tpu.memory_space<vmem>>, vector<1x128x256xf32>
    %50 = vector.shape_cast %49 : vector<1x128x256xf32> to vector<128x256xf32>
    %cst_22 = arith.constant dense<0.000000e+00> : vector<64x256xf32>
    %51 = tpu.matmul %48, %50, %cst_22 {dimension_numbers = #tpu.dot_dimension_numbers<[1], [0], [0], [1], [0, 0, 1, 1], [], []>} : vector<64x128xf32>, vector<128x256xf32>, vector<64x256xf32> -> vector<64x256xf32>
    %52 = arith.addf %47, %51 : vector<64x256xf32>
    %53 = vector.shape_cast %43 : vector<4x16x128xf32> to vector<64x128xf32>
    %c2 = arith.constant 2 : index
    %c0_23 = arith.constant 0 : index
    %c0_24 = arith.constant 0 : index
    %54 = vector.load %arg5[%c2, %c0_23, %c0_24] : memref<3x128x256xf32, #tpu.memory_space<vmem>>, vector<1x128x256xf32>
    %55 = vector.shape_cast %54 : vector<1x128x256xf32> to vector<128x256xf32>
    %cst_25 = arith.constant dense<0.000000e+00> : vector<64x256xf32>
    %56 = tpu.matmul %53, %55, %cst_25 {dimension_numbers = #tpu.dot_dimension_numbers<[1], [0], [0], [1], [0, 0, 1, 1], [], []>} : vector<64x128xf32>, vector<128x256xf32>, vector<64x256xf32> -> vector<64x256xf32>
    %57 = arith.addf %52, %56 : vector<64x256xf32>
    %c0_26 = arith.constant 0 : index
    %c0_27 = arith.constant 0 : index
    %58 = vector.load %arg6[%c0_26, %c0_27] : memref<1x256xf32, #tpu.memory_space<vmem>>, vector<1x256xf32>
    %59 = vector.broadcast %58 : vector<1x256xf32> to vector<64x256xf32>
    %60 = arith.addf %57, %59 : vector<64x256xf32>
    %61 = vector.shape_cast %60 : vector<64x256xf32> to vector<4x16x256xf32>
    %c0_28 = arith.constant 0 : index
    %c0_29 = arith.constant 0 : index
    %c0_30 = arith.constant 0 : index
    %62 = vector.load %arg7[%c0_28, %c0_29, %c0_30] : memref<4x16x256xf32, #tpu.memory_space<vmem>>, vector<4x16x256xf32>
    tpu.vector_store %arg7[%c0_28, %c0_29, %c0_30], %61 {strides = array<i32>} : memref<4x16x256xf32, #tpu.memory_space<vmem>>, vector<4x16x256xf32>,
    return
  }
  func.func @transform_0(%arg0: i32) -> (i32, i32, i32) {
    %c0_i32 = arith.constant 0 : i32
    %c0_i32_0 = arith.constant 0 : i32
    %c0_i32_1 = arith.constant 0 : i32
    return %arg0, %c0_i32, %c0_i32_0 : i32, i32, i32
  }
  func.func @transform_1(%arg0: i32) -> (i32, i32) {
    %c0_i32 = arith.constant 0 : i32
    %c0_i32_0 = arith.constant 0 : i32
    %c0_i32_1 = arith.constant 0 : i32
    return %c0_i32, %c0_i32_0 : i32, i32
  }
  func.func @transform_2(%arg0: i32) -> (i32, i32) {
    %c0_i32 = arith.constant 0 : i32
    %c0_i32_0 = arith.constant 0 : i32
    %c0_i32_1 = arith.constant 0 : i32
    return %c0_i32, %c0_i32_0 : i32, i32
  }
  func.func @transform_3(%arg0: i32) -> (i32, i32) {
    %c0_i32 = arith.constant 0 : i32
    %c0_i32_0 = arith.constant 0 : i32
    %c0_i32_1 = arith.constant 0 : i32
    return %c0_i32, %c0_i32_0 : i32, i32
  }
  func.func @transform_4(%arg0: i32) -> (i32, i32, i32) {
    %c0_i32 = arith.constant 0 : i32
    %c0_i32_0 = arith.constant 0 : i32
    %c0_i32_1 = arith.constant 0 : i32
    %c0_i32_2 = arith.constant 0 : i32
    return %c0_i32, %c0_i32_0, %c0_i32_1 : i32, i32, i32
  }
  func.func @transform_5(%arg0: i32) -> (i32, i32) {
    %c0_i32 = arith.constant 0 : i32
    %c0_i32_0 = arith.constant 0 : i32
    %c0_i32_1 = arith.constant 0 : i32
    return %c0_i32, %c0_i32_0 : i32, i32
  }
  func.func @transform_6(%arg0: i32) -> (i32, i32, i32) {
    %c0_i32 = arith.constant 0 : i32
    %c0_i32_0 = arith.constant 0 : i32
    %c0_i32_1 = arith.constant 0 : i32
    return %arg0, %c0_i32, %c0_i32_0 : i32, i32, i32
  }
}

</mosaic_0001>

<bundles_post_ra>
// kernel: tpu_custom_call.1
= control target key start
LH: loop header
LB: loop body
LE: loop exit
PB: predicated region body
PF: predicated region fallthrough
CT: control target
= control target key end

     0   :  { %11 = vsyncpa [#allocation3], 0  ;;  %s2287_s0 = inlined_call_operand.vmem [shape: f32[8,16,128], index: 0, kind: input, shape index: {}]   ;;  %s2288_s1 = inlined_call_operand.vmem [shape: f32[128,4], index: 1, kind: input, shape index: {}]   ;;  %s2289_s2 = inlined_call_operand.vmem [shape: f32[4,128], index: 2, kind: input, shape index: {}]   ;;  %s2290_s3 = inlined_call_operand.vmem [shape: f32[1,128], index: 3, kind: input, shape index: {}]   ;;  %s2291_s4 = inlined_call_operand.hbm [shape: f32[3,128,256], index: 4, kind: input, shape index: {}]   ;;  %s2292_s5 = inlined_call_operand.vmem [shape: f32[1,256], index: 5, kind: input, shape index: {}]   ;;  %s2293_s6 = inlined_call_operand.hbm [shape: f32[8,16,256], index: 6, kind: output, shape index: {}]  }
   0x1   :  { %12 = vsyncpa [#allocation4], 0 }
   0x2   :  { %14 = vsyncpa [#allocation4 + $0x1], 0  ;;  %s1848_s21 = smov 0   ;;  %s1850_s22 = smov 0  }
   0x3   :  { %s1852_s23 = smov 0   ;;  %s1854_s24 = smov 0  }
   0x4 LB: > { %s1869_s25 = sadd.s32 4294967295, %s1801_s24   ;;  %s1362_s26 = sadd.s32 4294967294, %s1801_s24   ;;  %s1801_s24 = sphi %s1854_s24, %s2311_s24   ;;  %s1797_s23 = sphi %s1852_s23, %s2310_s23   ;;  %s1793_s22 = sphi %s1850_s22, %s2309_s22   ;;  %s1789_s21 = sphi %s1848_s21, %s2308_s21  }
   0x5   : > { %s1873_s27 = sadd.s32 1, %s1801_s24   ;;  %s158_s28 = sadd.s32 1, %s1797_s23 }
   0x6   : > { %s155_s29 = ssub.s32 %s1801_s24, %s1873_s27  ;;  %p168_p0 = scmp.ne.s32.totalorder %s1797_s23, %s1793_s22 }
   0x7   : > { %p156_p1 = scmp.eq.s32.totalorder %s155_s29, 0  ;;  %p169_p2 = scmp.eq.s32.totalorder %s1869_s25, 1 }
   0x8   : > { %p174_p3 = scmp.ne.s32.totalorder %s1793_s22, %s1789_s21  ;;  %p175_p4 = scmp.eq.s32.totalorder %s1362_s26, 1 }
   0x9   : > { %s1884_s30 = scalar_select %p156_p1, %s1797_s23, %s158_s28  }
   0xa   : > { %p1886_p5 = por %p169_p2, %p168_p0  ;;  %p1890_p6 = por %p175_p4, %p174_p3 }
   0xb   : > { %p1363_p7 = scmp.ge.s32.totalorder %s1801_s24, 1  ;;  %p182_p8 = scmp.lt.s32.totalorder %s1801_s24, 3 }
   0xc   : > { %s2297_s7 = scalar_select %p1886_p5, 1, 0 }
   0xd   : > { %s2298_s8 = scalar_select %p1890_p6, 1, 0 }
   0xe   : > { %p2294_p9 = scmp.eq.s32.totalorder %s1869_s25, 0  ;;  %p1897_p10 = pnand %p1363_p7, %p182_p8 }
   0xf   : > { %s1803_s10 = smov [#allocation2]   ;;  %s1707_s15 = scalar_lea.hbm %s2291_s4, 12288 }
  0x10   : > { %s2299_s9 = scalar_select %p1897_p10, 1, 0 }
  0x11   : > { %s203_s11 = sshll.u32 %s1803_s10, 4  ;;  %p1621_p11 = pneg %p1897_p10  ;;  %s204_s11 = int_to_ptr.vmem [resolvable:$true] %s203_s11 }
  0x12   : > { %p1708_p13 = scmp.ne.s32.totalorder %s2291_s4, %s1707_s15  ;;  %p1714_p3 = scmp.lt.u32.totalorder %s1707_s15, %s2291_s4 }
  0x13   : > { %p1905_p12 = pnand %p2294_p9, %p1621_p11 }
  0x15   : > { %p1709_p0 = pneg %p1905_p12 }
  0x17   : > { %p1710_p1 = pnand %p1709_p0, %p1708_p13 }
  0x19   : > { %p1711_p2 = pneg %p1710_p1 }
  0x1b   : > { %p1716_p4 = pnand %p1714_p3, %p1711_p2 }
  0x1d   : > { %1719 = shalt.err (!%p1716_p4)
}
  0x1e   : > { %s1720_s20 = scalar_lea.vmem %s204_s11, 12288  ;;  %p1728_p9 = scmp.lt.s32.totalorder %s204_s11, %s204_s11 }
  0x1f   : > { %p1721_p7 = scmp.ne.s32.totalorder %s204_s11, %s1720_s20  ;;  %p1729_p6 = scmp.lt.s32.totalorder %s1720_s20, %s1720_s20 }
  0x21   : > { %p1723_p8 = pnand %p1721_p7, %p1709_p0  ;;  %p1730_p5 = por %p1729_p6, %p1728_p9 }
  0x23   : > { %p1724_p11 = pneg %p1723_p8 }
  0x25   : > { %p1731_p10 = pnand %p1730_p5, %p1724_p11 }
  0x27   : > { %1734 = shalt.err (!%p1731_p10)
}
  0x28   : > { %s1804_s26 = smov 256   ;;  %s1805_s28 = smov 16  }
  0x29   : > { %1624 = dma.hbm_to_vmem [thread:$0]  (!%p1905_p12), %s2291_s4, 12288, %s204_s11, [#allocation3], %s1804_s26, %s1804_s26, %s1805_s28  }
  0x2a   : > { %p2301_p13 = scmp.ne.s32.totalorder %s2299_s9, 0 }
  0x2b   : > { %p2302_p1 = scmp.eq.s32.totalorder (!%p2301_p13), %s1869_s25, 0 }
  0x2c   : > { %232 = sbr.rel (%p2301_p13) target bundleno = 870 (0x366), region = 44 }
  0x33   : > { %1780 = dma.done.wait (%p2302_p1), [#allocation3], 12288   ;;  %p2303_p0 = pmov %p2302_p1 }
  0x34   : > { %s1369_s13 = sshll.u32 %s1869_s25, 2  ;;  %v1806_v0 = vmov 0.0|0.0   ;;  %vm1807_vm0 = vmmov 0   ;;  %v1808_v1 = vmov 0.0   ;;  %v367_v2 = vld [vmem:[%s2288_s1] sm:$0xff]  ;;  %v368_v3 = vld [vmem:[%s2288_s1 + $0x8] sm:$0xff] }
  0x35   : > { %1782 = vsyncadd (%p2303_p0), [#allocation3], 4294955008  ;;  %1463 = vmatprep.subr.bf16.mxu0 %v1806_v0  ;;  %1455 = vmatprep.mubr.msk.f32.mxu0 %vm1807_vm0, %v1808_v1  ;;  %p264_p5 = scmp.lt.s32.totalorder %s1369_s13, 7  ;;  %v369_v4 = vld [vmem:[%s2288_s1 + $0x10] sm:$0xff]  ;;  %v1464_v5 = vpack.c.bf16 %v368_v3, %v367_v2  ;;  %v370_v6 = vld [vmem:[%s2288_s1 + $0x18] sm:$0xff]  ;;  %vm347_vm1 = vcmask 1041409  }
  0x36   : > { %1458 = vmatprep.subr.mxu1 %v1808_v1  ;;  %1460 = vmatprep.mubr.msk.f32.mxu1 %vm1807_vm0, %v1808_v1  ;;  %v371_v7 = vld [vmem:[%s2288_s1 + $0x20] sm:$0xff]  ;;  %v372_v8 = vld [vmem:[%s2288_s1 + $0x28] sm:$0xff]  ;;  %v373_v9 = vld [vmem:[%s2288_s1 + $0x30] sm:$0xff]  ;;  %v1467_v11 = vpack.c.bf16 %v370_v6, %v369_v4  ;;  %vm358_vm2 = vcmask 1045509   ;;  %vm349_vm3 = vcmask 1042434   ;;  %vm360_vm4 = vcmask 1046534  }
  0x37   : > { %s2313_s13 = smov (!%p264_p5, %s1369_s13), 7  ;;  %v374_v10 = vld [vmem:[%s2288_s1 + $0x38] sm:$0xff]  ;;  %1465 = vmatpush3.bf16.msra.mxu0 %v1464_v5  ;;  %v1966_v12 = vld [vmem:[%s2288_s1 + $0x40] sm:$0xff]  ;;  %v1971_v13 = vld [vmem:[%s2288_s1 + $0x48] sm:$0xff]  ;;  %v1470_v14 = vpack.c.bf16 %v372_v8, %v371_v7  ;;  %vm351_vm5 = vcmask 1043459   ;;  %vm362_vm6 = vcmask 1047559  }
  0x38   : > { %s1401_s9 = sshll.u32 %s2313_s13, 4  ;;  %1466 = vmatprep.subr.bf16.mxu0 %v1806_v0  ;;  %v1473_v15 = vpack.c.bf16 %v374_v10, %v373_v9  ;;  %v1476_v18 = vpack.c.bf16 %v1971_v13, %v1966_v12  ;;  %v377_v60 = vld [vmem:[%s2288_s1 + $0x50] sm:$0xff]  ;;  %v378_v61 = vld [vmem:[%s2288_s1 + $0x58] sm:$0xff]  ;;  %vm365_vm7 = vcmask 1043456   ;;  %vm470_vm8 = vcmask 31744   ;;  %s260_s29 = sand.u32 1, %s1793_s22  }
  0x39   : > { %s268_s16 = scalar_lea.vmem %s2287_s0, %s1401_s9  ;;  %vm726_vm9 = vcmask 1040384   ;;  %vm751_vm11 = vcmask 1046528   ;;  %s1368_s10 = sshll.u32 %s260_s29, 7 }
  0x3a   : > { %v1974_v16 = vld [vmem:[%s268_s16] sm:$0xff]  ;;  %v1976_v17 = vld [vmem:[%s268_s16 + $0x8] sm:$0xff]  ;;  %v1980_v19 = vld [vmem:[%s268_s16 + $0x10] sm:$0xff]  ;;  %s2201_s13 = scalar_lea.vmem [#allocation5], %s1368_s10  ;;  %s1403_s11 = sshll.u32 %s1869_s25, 11 }
  0x3b   : > { %v1982_v20 = vld [vmem:[%s268_s16 + $0x18] sm:$0xff]  ;;  %v1984_v21 = vld [vmem:[%s268_s16 + $0x20] sm:$0xff]  ;;  %v279_v22 = vadd.f32 %v1976_v17, %v1974_v16  ;;  %v307_v23 = vmul.f32 %v1974_v16, %v1974_v16  ;;  %v308_v24 = vmul.f32 %v1976_v17, %v1976_v17  ;;  %1468 = vmatpush3.bf16.msra.mxu0 %v1467_v11  ;;  %v1992_v25 = vld [vmem:[%s268_s16 + $0x28] sm:$0xff]  ;;  %v309_v29 = vmul.f32 %v1980_v19, %v1980_v19  ;;  %s1288_s12 = sshll.u32 %s2201_s13, 4  ;;  %s2246_s25 = scalar_lea.sflag [#allocation4], %s260_s29  ;;  %s2239_s12 = int_to_ptr.vmem [resolvable:$true] %s1288_s12 }
  0x3c   : > { %v1994_v26 = vld [vmem:[%s268_s16 + $0x30] sm:$0xff]  ;;  %v1996_v27 = vld [vmem:[%s268_s16 + $0x38] sm:$0xff]  ;;  %v286_v28 = vadd.f32 %v1982_v20, %v1980_v19  ;;  %v310_v30 = vmul.f32 %v1982_v20, %v1982_v20  ;;  %v311_v31 = vmul.f32 %v1984_v21, %v1984_v21  ;;  %1469 = vmatprep.subr.bf16.mxu0 %v1806_v0  ;;  %v293_v33 = vadd.f32 %v1992_v25, %v1984_v21  ;;  %vm2102_vm10 = vmneg %vm726_vm9  ;;  %s2237_s16 = scalar_lea.hbm %s2293_s6, %s1403_s11  ;;  %s1735_s17 = scalar_lea.vmem %s2239_s12, 2048 }
  0x3d   : > { %v280_v32 = vrot.slane %v279_v22, 4  ;;  %v300_v34 = vadd.f32 %v1996_v27, %v1994_v26  ;;  %v312_v35 = vmul.f32 %v1992_v25, %v1992_v25  ;;  %v313_v37 = vmul.f32 %v1994_v26, %v1994_v26  ;;  %p1736_p6 = scmp.ne.s32.totalorder %s2239_s12, %s1735_s17  ;;  %p2306_p9 = scmp.ne.s32.totalorder %s2297_s7, 0 }
  0x3e   : > { %v287_v36 = vrot.slane %v286_v28, 4  ;;  %v314_v38 = vmul.f32 %v1996_v27, %v1996_v27  ;;  %v315_v39 = vadd.f32 %v308_v24, %v307_v23  ;;  %v294_v41 = vrot.slane %v293_v33, 4  ;;  %s1810_s18 = smov [#allocation5]  }
  0x3f   : > { %v281_v40 = vadd.f32 %v280_v32, %v279_v22  ;;  %v301_v42 = vrot.slane %v300_v34, 4  ;;  %v322_v43 = vadd.f32 %v310_v30, %v309_v29  ;;  %1471 = vmatpush3.bf16.msra.mxu0 %v1470_v14  ;;  %v329_v46 = vadd.f32 %v312_v35, %v311_v31  ;;  %v379_v31 = vld [vmem:[%s2288_s1 + $0x60] sm:$0xff]  ;;  %v380_v32 = vld [vmem:[%s2288_s1 + $0x68] sm:$0xff]  ;;  %p1737_p10 = pnand %p1736_p6, %p2306_p9  ;;  %s1739_s19 = sshll.u32 %s1810_s18, 4  ;;  %s1740_s19 = int_to_ptr.vmem [resolvable:$false] %s1739_s19 }
  0x40   : > { %v288_v44 = vadd.f32 %v287_v36, %v286_v28  ;;  %v316_v45 = vrot.slane %v315_v39, 4  ;;  %v336_v47 = vadd.f32 %v314_v38, %v313_v37  ;;  %1472 = vmatprep.subr.bf16.mxu0 %v1806_v0  ;;  %v295_v49 = vadd.f32 %v294_v41, %v293_v33  ;;  %v382_v41 = vld [vmem:[%s2288_s1 + $0x78] sm:$0xff]  ;;  %s1741_s20 = scalar_lea.vmem %s1740_s19, 4096  ;;  %p1742_p2 = scmp.lt.s32.totalorder %s2239_s12, %s1740_s19 }
  0x41   : > { %v282_v48 = vrot.slane %v281_v40, 2  ;;  %v302_v50 = vadd.f32 %v301_v42, %v300_v34  ;;  %v323_v51 = vrot.slane %v322_v43, 4  ;;  %v330_v54 = vrot.slane %v329_v46, 4  ;;  %p1738_p12 = pneg %p1737_p10  ;;  %p1743_p3 = scmp.lt.s32.totalorder %s1741_s20, %s1735_s17 }
  0x42   : > { %v289_v52 = vrot.slane %v288_v44, 2  ;;  %v317_v53 = vadd.f32 %v316_v45, %v315_v39  ;;  %v337_v55 = vrot.slane %v336_v47, 4  ;;  %v296_v57 = vrot.slane %v295_v49, 2 }
  0x43   : > { %v283_v56 = vadd.f32 %v282_v48, %v281_v40  ;;  %v303_v58 = vrot.slane %v302_v50, 2  ;;  %v324_v59 = vadd.f32 %v323_v51, %v322_v43  ;;  %1474 = vmatpush3.bf16.msra.mxu0 %v1473_v15  ;;  %v331_v2 = vadd.f32 %v330_v54, %v329_v46  ;;  %v381_v40 = vld [vmem:[%s2288_s1 + $0x70] sm:$0xff]  ;;  %v469_v51 = vld [vmem:[%s2289_s2] sm:$0xf]  ;;  %p1744_p4 = por %p1743_p3, %p1742_p2 }
  0x44   : > { %v290_v62 = vadd.f32 %v289_v52, %v288_v44  ;;  %v318_v63 = vrot.slane %v317_v53, 2  ;;  %v338_v3 = vadd.f32 %v337_v55, %v336_v47  ;;  %1475 = vmatprep.subr.bf16.mxu0 %v1806_v0  ;;  %v297_v5 = vadd.f32 %v296_v57, %v295_v49  ;;  %1459 = vmatpush3.msk.msra.mxu1 %vm365_vm7, %v469_v51  ;;  %v824_v51 = vld [vmem:[#allocation2 + $0x78] sm:$0xff] }
  0x45   : > { %v284_v4 = vrot.slane %v283_v56, 1  ;;  %v304_v6 = vadd.f32 %v303_v58, %v302_v50  ;;  %v325_v7 = vrot.slane %v324_v59, 2  ;;  %v332_v10 = vrot.slane %v331_v2, 2  ;;  %p1745_p7 = pnand %p1744_p4, %p1738_p12 }
  0x46   : > { %v291_v8 = vrot.slane %v290_v62, 1  ;;  %v319_v9 = vadd.f32 %v318_v63, %v317_v53  ;;  %v339_v11 = vrot.slane %v338_v3, 2  ;;  %v1479_v14 = vpack.c.bf16 %v378_v61, %v377_v60  ;;  %v778_v63 = vld [vmem:[#allocation2 + $0x108] sm:$0xff] }
  0x47   : > { %v285_v15 = vadd.f32 %v284_v4, %v283_v56  ;;  %v298_v22 = vrot.slane %v297_v5, 1  ;;  %v326_v23 = vadd.f32 %v325_v7, %v324_v59  ;;  %1477 = vmatpush3.bf16.msra.mxu0 %v1476_v18  ;;  %v333_v29 = vadd.f32 %v332_v10, %v331_v2  ;;  %v780_v2 = vld [vmem:[#allocation2 + $0x118] sm:$0xff]  ;;  %v777_v4 = vld [vmem:[#allocation2 + $0x100] sm:$0xff]  ;;  %v810_v7 = vld [vmem:[#allocation2 + $0x8] sm:$0xff] }
  0x48   : > { %v292_v24 = vadd.f32 %v291_v8, %v290_v62  ;;  %v320_v28 = vrot.slane %v319_v9, 1  ;;  %v340_v30 = vadd.f32 %v339_v11, %v338_v3  ;;  %1478 = vmatprep.subr.bf16.mxu0 %v1806_v0  ;;  %v305_v33 = vrot.slane %v304_v6, 1  ;;  %v812_v8 = vld [vmem:[#allocation2 + $0x18] sm:$0xff]  ;;  %v809_v10 = vld [vmem:[#allocation2] sm:$0xff]  ;;  %v811_v11 = vld [vmem:[#allocation2 + $0x10] sm:$0xff] }
  0x49   : > { %v327_v34 = vrot.slane %v326_v23, 1  ;;  %v299_v35 = vadd.f32 %v298_v22, %v297_v5  ;;  %v334_v13 = vrot.slane %v333_v29, 1  ;;  %v1482_v38 = vpack.c.bf16 %v380_v32, %v379_v31  ;;  %v779_v5 = vld [vmem:[#allocation2 + $0x110] sm:$0xff]  ;;  %v784_v22 = vld [vmem:[#allocation2 + $0x138] sm:$0xff]  ;;  %v813_v32 = vld [vmem:[#allocation2 + $0x20] sm:$0xff] }
  0x4a   : > { %v321_v12 = vadd.f32 %v320_v28, %v319_v9  ;;  %v341_v18 = vrot.slane %v340_v30, 1  ;;  %v348_v37 = vsel %vm347_vm1, %v292_v24, %v285_v15  ;;  %v306_v42 = vadd.f32 %v305_v33, %v304_v6  ;;  %v783_v24 = vld [vmem:[#allocation2 + $0x130] sm:$0xff]  ;;  %v816_v31 = vld [vmem:[#allocation2 + $0x38] sm:$0xff] }
  0x4b   : > { %v328_v36 = vadd.f32 %v327_v34, %v326_v23  ;;  %1480 = vmatpush3.bf16.msra.mxu0 %v1479_v14  ;;  %v335_v39 = vadd.f32 %v334_v13, %v333_v29  ;;  %v350_v45 = vsel %vm349_vm3, %v299_v35, %v348_v37  ;;  %v1485_v47 = vpack.c.bf16 %v382_v41, %v381_v40  ;;  %v782_v14 = vld [vmem:[#allocation2 + $0x128] sm:$0xff]  ;;  %v781_v23 = vld [vmem:[#allocation2 + $0x120] sm:$0xff]  ;;  %v815_v34 = vld [vmem:[#allocation2 + $0x30] sm:$0xff] }
  0x4c   : > { %1481 = vmatprep.subr.bf16.mxu0 %v1806_v0  ;;  %v342_v43 = vadd.f32 %v341_v18, %v340_v30  ;;  %v352_v48 = vsel %vm351_vm5, %v306_v42, %v350_v45  ;;  %v1519_v3 = vpack.c.bf16 %v780_v2, %v778_v63  ;;  %v1521_v6 = vpack.c.bf16 %v779_v5, %v777_v4  ;;  %v814_v30 = vld [vmem:[#allocation2 + $0x28] sm:$0xff]  ;;  %v787_v37 = vld [vmem:[#allocation2 + $0x150] sm:$0xff]  ;;  %v820_v40 = vld [vmem:[#allocation2 + $0x58] sm:$0xff] }
  0x4d   : > { %v359_v44 = vsel %vm358_vm2, %v328_v36, %v321_v12  ;;  %v1487_v9 = vpack.c.bf16 %v812_v8, %v810_v7  ;;  %v1489_v15 = vpack.c.bf16 %v811_v11, %v809_v10  ;;  %v1523_v28 = vpack.c.bf16 %v784_v22, %v782_v14  ;;  %v786_v35 = vld [vmem:[#allocation2 + $0x148] sm:$0xff]  ;;  %v788_v12 = vld [vmem:[#allocation2 + $0x158] sm:$0xff]  ;;  %v785_v36 = vld [vmem:[#allocation2 + $0x140] sm:$0xff] }
  0x4e   : > { %v361_v46 = vsel %vm360_vm4, %v335_v39, %v359_v44  ;;  %1520 = vmatprep.subr.bf16.mxu1 %v1519_v3  ;;  %v1525_v29 = vpack.c.bf16 %v783_v24, %v781_v23  ;;  %v1491_v33 = vpack.c.bf16 %v816_v31, %v814_v30  ;;  %v1493_v13 = vpack.c.bf16 %v815_v34, %v813_v32  ;;  %v817_v41 = vld [vmem:[#allocation2 + $0x40] sm:$0xff]  ;;  %v819_v42 = vld [vmem:[#allocation2 + $0x50] sm:$0xff]  ;;  %v790_v44 = vld [vmem:[#allocation2 + $0x168] sm:$0xff] }
  0x4f   : > { %1483 = vmatpush3.bf16.msra.mxu0 %v1482_v38  ;;  %v363_v49 = vsel %vm362_vm6, %v342_v43, %v361_v46  ;;  %v1527_v18 = vpack.c.bf16 %v788_v12, %v786_v35  ;;  %v818_v38 = vld [vmem:[#allocation2 + $0x48] sm:$0xff]  ;;  %v1529_v39 = vpack.c.bf16 %v787_v37, %v785_v36  ;;  %v792_v45 = vld [vmem:[#allocation2 + $0x178] sm:$0xff]  ;;  %v789_v46 = vld [vmem:[#allocation2 + $0x160] sm:$0xff] }
  0x50   : > { %1484 = vmatprep.subr.bf16.mxu0 %v1806_v0  ;;  %v366_v50 = vsel %vm365_vm7, %v352_v48, %v363_v49  ;;  %v1495_v43 = vpack.c.bf16 %v820_v40, %v818_v38  ;;  %v1531_v48 = vpack.c.bf16 %v792_v45, %v790_v44  ;;  %v791_v49 = vld [vmem:[#allocation2 + $0x170] sm:$0xff]  ;;  %v798_v63 = vld [vmem:[#allocation2 + $0x1a8] sm:$0xff]  ;;  %v800_v2 = vld [vmem:[#allocation2 + $0x1b8] sm:$0xff] }
  0x51   : > { %v825_v4 = vld [vmem:[#allocation2 + $0x80] sm:$0xff]  ;;  %v827_v5 = vld [vmem:[#allocation2 + $0x90] sm:$0xff]  ;;  %v830_v7 = vld [vmem:[#allocation2 + $0xa8] sm:$0xff] }
  0x52   : > { %v832_v8 = vld [vmem:[#allocation2 + $0xb8] sm:$0xff]  ;;  %v797_v10 = vld [vmem:[#allocation2 + $0x1a0] sm:$0xff]  ;;  %v799_v11 = vld [vmem:[#allocation2 + $0x1b0] sm:$0xff]  ;;  %v1505_v14 = vpack.c.bf16 %v827_v5, %v825_v4 }
  0x53   : > { %1486 = vmatpush3.bf16.msra.mxu0 %v1485_v47  ;;  %v1497_v47 = vpack.c.bf16 %v819_v42, %v817_v41  ;;  %v804_v22 = vld [vmem:[#allocation2 + $0x1d8] sm:$0xff]  ;;  %v1507_v23 = vpack.c.bf16 %v832_v8, %v830_v7  ;;  %v829_v24 = vld [vmem:[#allocation2 + $0xa0] sm:$0xff]  ;;  %v834_v30 = vld [vmem:[#allocation2 + $0xc8] sm:$0xff] }
  0x54   : > { %1488 = vmatprep.subr.bf16.mxu0 %v1487_v9  ;;  %v1539_v9 = vpack.c.bf16 %v800_v2, %v798_v63  ;;  %v836_v31 = vld [vmem:[#allocation2 + $0xd8] sm:$0xff]  ;;  %v803_v34 = vld [vmem:[#allocation2 + $0x1d0] sm:$0xff]  ;;  %v806_v12 = vld [vmem:[#allocation2 + $0x1e8] sm:$0xff] }
  0x55   : > { %v833_v36 = vld [vmem:[#allocation2 + $0xc0] sm:$0xff]  ;;  %v835_v37 = vld [vmem:[#allocation2 + $0xd0] sm:$0xff]  ;;  %v840_v40 = vld [vmem:[#allocation2 + $0xf8] sm:$0xff] }
  0x56   : > { %1456 = vmatmul.mubr.f32.vlgmr.msra.gmra.mrb[0].mxu0 %v366_v50  ;;  %v822_v50 = vld [vmem:[#allocation2 + $0x68] sm:$0xff]  ;;  %v805_v42 = vld [vmem:[#allocation2 + $0x1e0] sm:$0xff]  ;;  %v1513_v44 = vpack.c.bf16 %v835_v37, %v833_v36 }
  0x57   : > { %905 = vmatprep.mubr.f32.mxu0 %v1808_v1  ;;  %1490 = vmatpush1.bf16.msra.mxu0 %v1489_v15  ;;  %v802_v15 = vld [vmem:[#allocation2 + $0x1c8] sm:$0xff] }
  0x58   : > { %1492 = vmatprep.subr.bf16.mxu0 %v1491_v33  ;;  %v1543_v32 = vpack.c.bf16 %v804_v22, %v802_v15  ;;  %v801_v33 = vld [vmem:[#allocation2 + $0x1c0] sm:$0xff]  ;;  %v1069_v45 = vld [vmem:[#allocation2 + $0x208] sm:$0xff] }
  0x59   : > { %v1545_v38 = vpack.c.bf16 %v803_v34, %v801_v33 }
  0x5b   : > { %1494 = vmatpush1.bf16.msra.mxu0 %v1493_v13  ;;  %v808_v13 = vld [vmem:[#allocation2 + $0x1f8] sm:$0xff] }
  0x5c   : > { %1496 = vmatprep.subr.bf16.mxu0 %v1495_v43  ;;  %v1547_v41 = vpack.c.bf16 %v808_v13, %v806_v12  ;;  %v807_v43 = vld [vmem:[#allocation2 + $0x1f0] sm:$0xff] }
  0x5f   : > { %1498 = vmatpush1.bf16.msra.mxu0 %v1497_v47 }
 0x129   : > { %v449_v52 = vpop.f32.mrb[0].mxu0 }
 0x12a   : > { %v453_v53 = vmul.f32 0.001953125, %v449_v52  ;;  %v1457_v54 = vpop.f32.mrb[1].mxu0  ;;  %v1499_v52 = vpack.c.bf16 %v824_v51, %v822_v50  ;;  %v1549_v50 = vpack.c.bf16 %v807_v43, %v805_v42 }
 0x12b   : > { %v823_v54 = vld [vmem:[#allocation2 + $0x70] sm:$0xff] }
 0x12c   : > { %v454_v55 = vmul.f32 %v453_v53, %v453_v53  ;;  %1500 = vmatprep.subr.bf16.mxu0 %v1499_v52 }
 0x12e   : > { %v456_v0 = vrot.slane %v454_v55, 4  ;;  %v794_v55 = vld [vmem:[#allocation2 + $0x188] sm:$0xff] }
 0x130   : > { %v458_v56 = vsub.f32 %v453_v53, %v456_v0  ;;  %v1533_v0 = vpack.c.bf16 %v791_v49, %v789_v46  ;;  %v1071_v46 = vld [vmem:[#allocation2 + $0x218] sm:$0xff]  ;;  %v839_v49 = vld [vmem:[#allocation2 + $0xf0] sm:$0xff] }
 0x131   : > { %v1551_v51 = vpack.c.bf16 %v1071_v46, %v1069_v45 }
 0x132   : > { %v459_v57 = vadd.f32 1e-05, %v458_v56  ;;  %v796_v56 = vld [vmem:[#allocation2 + $0x198] sm:$0xff] }
 0x134   : > { %1673 = vrsqrt.f32 %v459_v57  ;;  %v793_v57 = vld [vmem:[#allocation2 + $0x180] sm:$0xff] }
 0x13e   : > { %v1674_v58 = vpop.eup %1673 }
 0x13f   : > { %v462_v59 = vrot.slane %v1674_v58, 4  ;;  %v1535_v58 = vpack.c.bf16 %v796_v56, %v794_v55  ;;  %v551_v55 = vlaneseq }
 0x141   : > { %v464_v60 = vmul.f32 %v462_v59, %v453_v53  ;;  %v821_v53 = vld [vmem:[#allocation2 + $0x60] sm:$0xff]  ;;  %v2053_v56 = vshrl.u32 %v551_v55, 7 }
 0x143   : > { %v466_v61 = vrot.slane %v464_v60, 4  ;;  %v826_v60 = vld [vmem:[#allocation2 + $0x88] sm:$0xff] }
 0x145   : > { %v468_v62 = vsel %vm365_vm7, %v462_v59, %v466_v61  ;;  %v795_v59 = vld [vmem:[#allocation2 + $0x190] sm:$0xff]  ;;  %v828_v61 = vld [vmem:[#allocation2 + $0x98] sm:$0xff] }
 0x146   : > { %1461 = vmatmul.mubr.msk.f32.vlgmr.msra.gmra.mrb[0].mxu1 %vm470_vm8, %v468_v62  ;;  %v1501_v62 = vpack.c.bf16 %v823_v54, %v821_v53  ;;  %v1503_v3 = vpack.c.bf16 %v828_v61, %v826_v60  ;;  %v1809_v53 = vmov 1966171168  }
 0x147   : > { %1018 = vmatprep.mubr.f32.mxu1 %v1808_v1  ;;  %1522 = vmatpush1.bf16.msra.mxu1 %v1521_v6  ;;  %v1537_v6 = vpack.c.bf16 %v795_v59, %v793_v57  ;;  %v549_v54 = vunpack.c.l.s4 %v1809_v53 }
 0x148   : > { %1524 = vmatprep.subr.bf16.mxu1 %v1523_v28  ;;  %1502 = vmatpush1.bf16.msra.mxu0 %v1501_v62  ;;  %v831_v28 = vld [vmem:[#allocation2 + $0xb0] sm:$0xff]  ;;  %v2060_v62 = vsub.s32 0, %v2053_v56 }
 0x149   : > { %1504 = vmatprep.subr.bf16.mxu0 %v1503_v3  ;;  %v1509_v35 = vpack.c.bf16 %v831_v28, %v829_v24 }
 0x14b   : > { %1526 = vmatpush1.bf16.msra.mxu1 %v1525_v29  ;;  %v1541_v29 = vpack.c.bf16 %v799_v11, %v797_v10 }
 0x14c   : > { %1528 = vmatprep.subr.bf16.mxu1 %v1527_v18  ;;  %1506 = vmatpush1.bf16.msra.mxu0 %v1505_v14  ;;  %v1511_v18 = vpack.c.bf16 %v836_v31, %v834_v30 }
 0x14d   : > { %1508 = vmatprep.subr.bf16.mxu0 %v1507_v23 }
 0x14f   : > { %1530 = vmatpush1.bf16.msra.mxu1 %v1529_v39  ;;  %v838_v39 = vld [vmem:[#allocation2 + $0xe8] sm:$0xff] }
 0x150   : > { %1532 = vmatprep.subr.bf16.mxu1 %v1531_v48  ;;  %1510 = vmatpush1.bf16.msra.mxu0 %v1509_v35  ;;  %v1515_v47 = vpack.c.bf16 %v840_v40, %v838_v39  ;;  %v837_v48 = vld [vmem:[#allocation2 + $0xe0] sm:$0xff] }
 0x151   : > { %1512 = vmatprep.subr.bf16.mxu0 %v1511_v18  ;;  %v1517_v52 = vpack.c.bf16 %v839_v49, %v837_v48 }
 0x153   : > { %1534 = vmatpush1.bf16.msra.mxu1 %v1533_v0  ;;  %v550_v0 = vunpack.c.0.s8 %v549_v54 }
 0x154   : > { %1536 = vmatprep.subr.bf16.mxu1 %v1535_v58  ;;  %1514 = vmatpush1.bf16.msra.mxu0 %v1513_v44  ;;  %v1374_v58 = vld [vmem:[%s2290_s3] ss:$0 sm:$0xff] }
 0x155   : > { %1516 = vmatprep.subr.bf16.mxu0 %v1515_v47  ;;  %v553_v57 = vsub.s32 %v550_v0, %v2053_v56  ;;  %v1068_v0 = vld [vmem:[#allocation2 + $0x200] sm:$0xff] }
 0x157   : > { %1538 = vmatpush1.bf16.msra.mxu1 %v1537_v6 }
 0x158   : > { %1540 = vmatprep.subr.bf16.mxu1 %v1539_v9  ;;  %1518 = vmatpush1.bf16.msra.mxu0 %v1517_v52 }
 0x15b   : > { %1542 = vmatpush1.bf16.msra.mxu1 %v1541_v29 }
 0x15c   : > { %1544 = vmatprep.subr.bf16.mxu1 %v1543_v32 }
 0x15f   : > { %1546 = vmatpush1.bf16.msra.mxu1 %v1545_v38 }
 0x160   : > { %1548 = vmatprep.subr.bf16.mxu1 %v1547_v41 }
 0x163   : > { %1550 = vmatpush1.bf16.msra.mxu1 %v1549_v50 }
 0x164   : > { %1552 = vmatprep.subr.bf16.mxu1 %v1551_v51 }
 0x219   : > { %v543_v59 = vpop.f32.mrb[0].mxu1 }
 0x21a   : > { %v554_v60 = vrot.slane %v543_v59, %v553_v57  ;;  %v579_v61 = vsub.f32 %v1374_v58, %v543_v59  ;;  %v1462_v63 = vpop.f32.mrb[1].mxu1  ;;  %v1073_v58 = vld [vmem:[#allocation2 + $0x228] sm:$0xff]  ;;  %v1075_v59 = vld [vmem:[#allocation2 + $0x238] sm:$0xff] }
 0x21c   : > { %v555_v2 = vcombine.high %v554_v60, %v554_v60  ;;  %v562_v3 = vrot.slane %v554_v60, %v553_v57  ;;  %v581_v4 = vcombine.high %v579_v61, %v579_v61 }
 0x21e   : > { %v569_v5 = vrot.slane %v555_v2, %v553_v57  ;;  %v570_v6 = vcombine.high %v562_v3, %v562_v3  ;;  %v588_v7 = vrot.slane %v581_v4, %v553_v57  ;;  %v609_v8 = vrot.slane %v562_v3, %v2060_v62 }
 0x220   : > { %v589_v9 = vcombine.high %v588_v7, %v588_v7  ;;  %v596_v10 = vrot.slane %v588_v7, %v553_v57  ;;  %v613_v11 = vrot.slane %v569_v5, %v2060_v62  ;;  %v617_v14 = vrot.slane %v570_v6, %v2060_v62  ;;  %v1072_v6 = vld [vmem:[#allocation2 + $0x220] sm:$0xff]  ;;  %v1074_v7 = vld [vmem:[#allocation2 + $0x230] sm:$0xff] }
 0x221   : > { %v626_v15 = vmul.f32 %v609_v8, %v1974_v16  ;;  %v627_v24 = vmul.f32 %v609_v8, %v1976_v17  ;;  %v571_v35 = vcombine.high %v569_v5, %v569_v5  ;;  %v1555_v5 = vpack.c.bf16 %v1075_v59, %v1073_v58 }
 0x222   : > { %v603_v22 = vrot.slane %v589_v9, %v553_v57  ;;  %v604_v23 = vcombine.high %v596_v10, %v596_v10  ;;  %v637_v28 = vrot.slane %v596_v10, %v2060_v62  ;;  %v628_v29 = vmul.f32 %v613_v11, %v1980_v19  ;;  %v1070_v57 = vld [vmem:[#allocation2 + $0x210] sm:$0xff] }
 0x223   : > { %v629_v30 = vmul.f32 %v613_v11, %v1982_v20  ;;  %v630_v16 = vmul.f32 %v617_v14, %v1984_v21  ;;  %v631_v19 = vmul.f32 %v617_v14, %v1992_v25  ;;  %v621_v39 = vrot.slane %v571_v35, %v2060_v62  ;;  %v1077_v11 = vld [vmem:[#allocation2 + $0x248] sm:$0xff]  ;;  %v1079_v14 = vld [vmem:[#allocation2 + $0x258] sm:$0xff] }
 0x224   : > { %v654_v31 = vadd.f32 %v637_v28, %v626_v15  ;;  %v2070_v32 = vadd.f32 %v637_v28, %v627_v24  ;;  %v641_v33 = vrot.slane %v603_v22, %v2060_v62  ;;  %v645_v34 = vrot.slane %v604_v23, %v2060_v62 }
 0x225   : > { %v605_v20 = vcombine.high %v603_v22, %v603_v22  ;;  %v632_v42 = vmul.f32 %v621_v39, %v1994_v26  ;;  %v633_v43 = vmul.f32 %v621_v39, %v1996_v27  ;;  %v1553_v2 = vpack.c.bf16 %v1070_v57, %v1068_v0  ;;  %v1082_v39 = vld [vmem:[#allocation2 + $0x270] sm:$0xff]  ;;  %v1093_v0 = vld [vmem:[#allocation2 + $0x2c8] sm:$0xff]  ;;  %v1095_v57 = vld [vmem:[#allocation2 + $0x2d8] sm:$0xff] }
 0x226   : > { %v1375_v12 = vmul.f32 -1.442695, %v654_v31  ;;  %v1376_v13 = vmul.f32 -1.442695, %v2070_v32  ;;  %v2076_v17 = vadd.f32 %v641_v33, %v628_v29  ;;  %v2078_v18 = vadd.f32 %v641_v33, %v629_v30  ;;  %v1081_v33 = vld [vmem:[#allocation2 + $0x268] sm:$0xff] }
 0x227   : > { %v2083_v38 = vadd.f32 %v645_v34, %v630_v16  ;;  %v2086_v21 = vadd.f32 %v645_v34, %v631_v19  ;;  %v649_v40 = vrot.slane %v605_v20, %v2060_v62  ;;  %v1557_v24 = vpack.c.bf16 %v1074_v7, %v1072_v6  ;;  %v1083_v34 = vld [vmem:[#allocation2 + $0x278] sm:$0xff] }
 0x228   : > { %1675 = vpow2.f32 %v1375_v12  ;;  %v1377_v36 = vmul.f32 -1.442695, %v2076_v17  ;;  %v1378_v37 = vmul.f32 -1.442695, %v2078_v18  ;;  %v1559_v30 = vpack.c.bf16 %v1079_v14, %v1077_v11 }
 0x229   : > { %1677 = vpow2.f32 %v1376_v13  ;;  %v1379_v41 = vmul.f32 -1.442695, %v2083_v38  ;;  %v1380_v25 = vmul.f32 -1.442695, %v2086_v21  ;;  %v2093_v44 = vadd.f32 %v649_v40, %v632_v42 }
 0x22a   : > { %1679 = vpow2.f32 %v1377_v36  ;;  %v2095_v45 = vadd.f32 %v649_v40, %v633_v43  ;;  %v1563_v36 = vpack.c.bf16 %v1083_v34, %v1081_v33  ;;  %v1085_v40 = vld [vmem:[#allocation2 + $0x288] sm:$0xff] }
 0x22b   : > { %1681 = vpow2.f32 %v1378_v37  ;;  %v1381_v49 = vmul.f32 -1.442695, %v2093_v44  ;;  %v1080_v37 = vld [vmem:[#allocation2 + $0x260] sm:$0xff] }
 0x22c   : > { %1683 = vpow2.f32 %v1379_v41  ;;  %v1382_v52 = vmul.f32 -1.442695, %v2095_v45 }
 0x22d   : > { %1685 = vpow2.f32 %v1380_v25 }
 0x232   : > { %v1676_v46 = vpop.eup %1675 }
 0x233   : > { %v1678_v47 = vpop.eup %1677  ;;  %v686_v48 = vadd.f32 1.0, %v1676_v46 }
 0x234   : > { %v1680_v50 = vpop.eup %1679  ;;  %v687_v51 = vadd.f32 1.0, %v1678_v47  ;;  %v1084_v47 = vld [vmem:[#allocation2 + $0x280] sm:$0xff] }
 0x235   : > { %v1682_v53 = vpop.eup %1681  ;;  %1687 = vrcp.f32 %v686_v48  ;;  %v688_v26 = vadd.f32 1.0, %v1680_v50  ;;  %v1086_v48 = vld [vmem:[#allocation2 + $0x290] sm:$0xff]  ;;  %v1091_v50 = vld [vmem:[#allocation2 + $0x2b8] sm:$0xff] }
 0x236   : > { %1689 = vrcp.f32 %v687_v51  ;;  %v689_v27 = vadd.f32 1.0, %v1682_v53  ;;  %v1684_v54 = vpop.eup %1683  ;;  %v1569_v53 = vpack.c.bf16 %v1086_v48, %v1084_v47 }
 0x237   : > { %1691 = vpow2.f32 %v1381_v49  ;;  %v1686_v55 = vpop.eup %1685  ;;  %v690_v60 = vadd.f32 1.0, %v1684_v54  ;;  %v1089_v49 = vld [vmem:[#allocation2 + $0x2a8] sm:$0xff]  ;;  %v1088_v54 = vld [vmem:[#allocation2 + $0x2a0] sm:$0xff] }
 0x238   : > { %1693 = vpow2.f32 %v1382_v52  ;;  %v691_v61 = vadd.f32 1.0, %v1686_v55  ;;  %v1090_v55 = vld [vmem:[#allocation2 + $0x2b0] sm:$0xff] }
 0x239   : > { %1695 = vrcp.f32 %v688_v26  ;;  %v1573_v59 = vpack.c.bf16 %v1090_v55, %v1088_v54 }
 0x23a   : > { %1697 = vrcp.f32 %v689_v27  ;;  %v1571_v27 = vpack.c.bf16 %v1091_v50, %v1089_v49 }
 0x23b   : > { %1699 = vrcp.f32 %v690_v60 }
 0x23c   : > { %1701 = vrcp.f32 %v691_v61  ;;  %v1575_v61 = vpack.c.bf16 %v1095_v57, %v1093_v0 }
 0x23f   : > { %v1688_v63 = vpop.eup %1687 }
 0x240   : > { %v1690_v3 = vpop.eup %1689  ;;  %v2099_v4 = vmul.f32 %v1688_v63, %v654_v31  ;;  %v1076_v31 = vld [vmem:[#allocation2 + $0x240] sm:$0xff] }
 0x241   : > { %v1692_v8 = vpop.eup %1691  ;;  %v2107_v10 = vmul.f32 %v1690_v3, %v2070_v32  ;;  %v1078_v32 = vld [vmem:[#allocation2 + $0x250] sm:$0xff]  ;;  %v1092_v63 = vld [vmem:[#allocation2 + $0x2c0] sm:$0xff]  ;;  %v1097_v3 = vld [vmem:[#allocation2 + $0x2e8] sm:$0xff] }
 0x242   : > { %v1694_v15 = vpop.eup %1693  ;;  %1019 = vmatmul.mubr.f32.vlgmr.msra.gmra.mrb[2].mxu1 %v2099_v4  ;;  %v727_v22 = vrot.slane %v2099_v4, 7  ;;  %v692_v35 = vadd.f32 1.0, %v1692_v8  ;;  %v1561_v19 = vpack.c.bf16 %v1078_v32, %v1076_v31 }
 0x243   : > { %v1696_v23 = vpop.eup %1695  ;;  %1554 = vmatpush1.bf16.msra.mxu1 %v1553_v2  ;;  %1024 = vmatprep.mubr.f32.mxu1 %v1808_v1  ;;  %v728_v28 = vrot.slane %v2107_v10, 7  ;;  %v693_v12 = vadd.f32 1.0, %v1694_v15  ;;  %v1094_v2 = vld [vmem:[#allocation2 + $0x2d0] sm:$0xff]  ;;  %v1096_v15 = vld [vmem:[#allocation2 + $0x2e0] sm:$0xff] }
 0x244   : > { %v1698_v29 = vpop.eup %1697  ;;  %1384 = vmatmul.mubr.msk.f32.vlgmr.msra.gmra.mrb[2].mxu0 %vm2102_vm10, %v727_v22  ;;  %1556 = vmatprep.subr.bf16.mxu1 %v1555_v5  ;;  %v2118_v16 = vmul.f32 %v1696_v23, %v2076_v17  ;;  %v1087_v17 = vld [vmem:[#allocation2 + $0x298] sm:$0xff]  ;;  %1703 = vrcp.f32 %v692_v35  ;;  %v1577_v8 = vpack.c.bf16 %v1094_v2, %v1092_v63 }
 0x245   : > { %911 = vmatprep.mubr.f32.mxu0 %v1808_v1  ;;  %v729_v13 = vsel %vm726_vm9, %v727_v22, %v728_v28  ;;  %v2123_v20 = vmul.f32 %v1698_v29, %v2078_v18  ;;  %1705 = vrcp.f32 %v693_v12  ;;  %v1700_v25 = vpop.eup %1699  ;;  %v1565_v18 = vpack.c.bf16 %v1082_v39, %v1080_v37  ;;  %v1099_v5 = vld [vmem:[#allocation2 + $0x2f8] sm:$0xff]  ;;  %v1098_v22 = vld [vmem:[#allocation2 + $0x2f0] sm:$0xff] }
 0x246   : > { %1025 = vmatmul.mubr.f32.gmra.mrb[4].mxu1 %v2107_v10  ;;  %v730_v41 = vrot.slane %v2118_v16, 7  ;;  %v1702_v43 = vpop.eup %1701  ;;  %v1567_v46 = vpack.c.bf16 %v1087_v17, %v1085_v40  ;;  %v2135_v51 = vmul.f32 %v1700_v25, %v2083_v38  ;;  %v1579_v14 = vpack.c.bf16 %v1099_v5, %v1097_v3 }
 0x247   : > { %1558 = vmatpush1.bf16.msra.mxu1 %v1557_v24  ;;  %1030 = vmatprep.mubr.f32.mxu1 %v1808_v1  ;;  %v731_v42 = vrot.slane %v2123_v20, 7  ;;  %v2140_v26 = vmul.f32 %v1702_v43, %v2086_v21  ;;  %v752_v28 = vrot.slane %v2099_v4, 1  ;;  %v755_v9 = vrot.slane %v2118_v16, 1 }
 0x248   : > { %912 = vmatmul.mubr.f32.gmra.mrb[4].mxu0 %v729_v13  ;;  %1560 = vmatprep.subr.bf16.mxu1 %v1559_v30  ;;  %v733_v38 = vrot.slane %v2135_v51, 7  ;;  %v758_v31 = vrot.slane %v2135_v51, 1 }
 0x249   : > { %917 = vmatprep.mubr.f32.mxu0 %v1808_v1  ;;  %v732_v52 = vsel %vm726_vm9, %v730_v41, %v731_v42  ;;  %v734_v21 = vrot.slane %v2140_v26, 7  ;;  %v759_v32 = vrot.slane %v2140_v26, 1 }
 0x24a   : > { %1031 = vmatmul.mubr.f32.gmra.mrb[6].mxu1 %v2118_v16 }
 0x24b   : > { %1562 = vmatpush1.bf16.msra.mxu1 %v1561_v19  ;;  %1036 = vmatprep.mubr.f32.mxu1 %v1808_v1  ;;  %v735_v7 = vsel %vm726_vm9, %v733_v38, %v734_v21  ;;  %v760_v33 = vsel %vm751_vm11, %v758_v31, %v759_v32 }
 0x24c   : > { %1386 = vmatmul.mubr.msk.f32.gmra.mrb[6].mxu0 %vm2102_vm10, %v730_v41  ;;  %1564 = vmatprep.subr.bf16.mxu1 %v1563_v36 }
 0x24d   : > { %923 = vmatprep.mubr.f32.mxu0 %v1808_v1 }
 0x24e   : > { %1037 = vmatmul.mubr.f32.gmra.mrb[8].mxu1 %v2123_v20  ;;  %v1704_v58 = vpop.eup %1703 }
 0x24f   : > { %1566 = vmatpush1.bf16.msra.mxu1 %v1565_v18  ;;  %1042 = vmatprep.mubr.f32.mxu1 %v1808_v1  ;;  %v1706_v60 = vpop.eup %1705  ;;  %v716_v6 = vmul.f32 %v1704_v58, %v2093_v44  ;;  %v1581_v44 = vpack.c.bf16 %v1098_v22, %v1096_v15 }
 0x250   : > { %924 = vmatmul.mubr.f32.gmra.mrb[8].mxu0 %v732_v52  ;;  %1568 = vmatprep.subr.bf16.mxu1 %v1567_v46  ;;  %v717_v11 = vmul.f32 %v1706_v60, %v2095_v45  ;;  %v753_v45 = vrot.slane %v2107_v10, 1  ;;  %v756_v10 = vrot.slane %v2123_v20, 1  ;;  %v1237_v46 = vsub.s32 1, %v2053_v56 }
 0x251   : > { %929 = vmatprep.mubr.f32.mxu0 %v1808_v1  ;;  %v736_v23 = vrot.slane %v716_v6, 7  ;;  %v761_v34 = vrot.slane %v716_v6, 1 }
 0x252   : > { %1043 = vmatmul.mubr.f32.gmra.mrb[10].mxu1 %v2135_v51  ;;  %v737_v24 = vrot.slane %v717_v11, 7  ;;  %v754_v30 = vsel %vm751_vm11, %v752_v28, %v753_v45  ;;  %v757_v4 = vsel %vm751_vm11, %v755_v9, %v756_v10  ;;  %v762_v35 = vrot.slane %v717_v11, 1 }
 0x253   : > { %1570 = vmatpush1.bf16.msra.mxu1 %v1569_v53  ;;  %1048 = vmatprep.mubr.f32.mxu1 %v1808_v1 }
 0x254   : > { %1388 = vmatmul.mubr.msk.f32.gmra.mrb[10].mxu0 %vm2102_vm10, %v733_v38  ;;  %1572 = vmatprep.subr.bf16.mxu1 %v1571_v27  ;;  %v738_v29 = vsel %vm726_vm9, %v736_v23, %v737_v24  ;;  %v763_v16 = vsel %vm751_vm11, %v761_v34, %v762_v35 }
 0x255   : > { %935 = vmatprep.mubr.f32.mxu0 %v1808_v1 }
 0x256   : > { %1049 = vmatmul.mubr.f32.gmra.mrb[12].mxu1 %v2140_v26 }
 0x257   : > { %1574 = vmatpush1.bf16.msra.mxu1 %v1573_v59  ;;  %1054 = vmatprep.mubr.f32.mxu1 %v1808_v1 }
 0x258   : > { %936 = vmatmul.mubr.f32.gmra.mrb[12].mxu0 %v735_v7  ;;  %1576 = vmatprep.subr.bf16.mxu1 %v1575_v61 }
 0x259   : > { %941 = vmatprep.mubr.f32.mxu0 %v1808_v1 }
 0x25a   : > { %1055 = vmatmul.mubr.f32.gmra.mrb[14].mxu1 %v716_v6 }
 0x25b   : > { %1578 = vmatpush1.bf16.msra.mxu1 %v1577_v8  ;;  %1060 = vmatprep.mubr.f32.mxu1 %v1808_v1 }
 0x25c   : > { %1390 = vmatmul.mubr.msk.f32.gmra.mrb[14].mxu0 %vm2102_vm10, %v736_v23  ;;  %1580 = vmatprep.subr.bf16.mxu1 %v1579_v14 }
 0x25d   : > { %947 = vmatprep.mubr.f32.mxu0 %v1808_v1 }
 0x25e   : > { %1061 = vmatmul.mubr.f32.gmra.mrb[16].mxu1 %v717_v11 }
 0x25f   : > { %1582 = vmatpush1.bf16.msra.mxu1 %v1581_v44  ;;  %1164 = vmatprep.mubr.f32.mxu1 %v1808_v1 }
 0x260   : > { %948 = vmatmul.mubr.f32.gmra.mrb[16].mxu0 %v738_v29 }
 0x262   : > { %1165 = vmatmul.mubr.f32.vlgmr.msra.gmra.mrb[2].mxu1 %v754_v30 }
 0x263   : > { %1170 = vmatprep.mubr.f32.mxu1 %v1808_v1 }
 0x266   : > { %1391 = vmatmul.mubr.msk.f32.gmra.mrb[4].mxu1 %vm751_vm11, %v753_v45 }
 0x267   : > { %1176 = vmatprep.mubr.f32.mxu1 %v1808_v1 }
 0x26a   : > { %1177 = vmatmul.mubr.f32.gmra.mrb[6].mxu1 %v757_v4 }
 0x26b   : > { %1182 = vmatprep.mubr.f32.mxu1 %v1808_v1 }
 0x26e   : > { %1392 = vmatmul.mubr.msk.f32.gmra.mrb[8].mxu1 %vm751_vm11, %v756_v10 }
 0x26f   : > { %1188 = vmatprep.mubr.f32.mxu1 %v1808_v1 }
 0x272   : > { %1189 = vmatmul.mubr.f32.gmra.mrb[10].mxu1 %v760_v33 }
 0x273   : > { %1194 = vmatprep.mubr.f32.mxu1 %v1808_v1 }
 0x276   : > { %1393 = vmatmul.mubr.msk.f32.gmra.mrb[12].mxu1 %vm751_vm11, %v759_v32 }
 0x277   : > { %1200 = vmatprep.mubr.f32.mxu1 %v1808_v1 }
 0x27a   : > { %1201 = vmatmul.mubr.f32.gmra.mrb[14].mxu1 %v763_v16 }
 0x27b   : > { %1206 = vmatprep.mubr.f32.mxu1 %v1808_v1  ;;  %v1229_v1 = vld [vmem:[%s2292_s5] sm:$0x3] }
 0x27c   : > { %v2191_v48 = vrot.slane %v1229_v1, %v2060_v62  ;;  %v2197_v50 = vrot.slane %v1229_v1, %v1237_v46 }
 0x27e   : > { %1394 = vmatmul.mubr.msk.f32.gmra.mrb[16].mxu1 %vm751_vm11, %v762_v35 }
 0x317   : > { %v907_v12 = vpop.f32.mrb[2].mxu0 }
 0x318   : > { %v909_v13 = vpop.f32.mrb[3].mxu0 }
 0x31b   : > { %v913_v19 = vpop.f32.mrb[4].mxu0 }
 0x31c   : > { %v915_v20 = vpop.f32.mrb[5].mxu0 }
 0x31f   : > { %v919_v36 = vpop.f32.mrb[6].mxu0 }
 0x320   : > { %v921_v37 = vpop.f32.mrb[7].mxu0 }
 0x323   : > { %v925_v39 = vpop.f32.mrb[8].mxu0 }
 0x324   : > { %v927_v40 = vpop.f32.mrb[9].mxu0 }
 0x327   : > { %v931_v17 = vpop.f32.mrb[10].mxu0 }
 0x328   : > { %v933_v41 = vpop.f32.mrb[11].mxu0 }
 0x32b   : > { %v937_v25 = vpop.f32.mrb[12].mxu0 }
 0x32c   : > { %v939_v18 = vpop.f32.mrb[13].mxu0 }
 0x32f   : > { %v943_v42 = vpop.f32.mrb[14].mxu0 }
 0x330   : > { %v945_v43 = vpop.f32.mrb[15].mxu0 }
 0x333   : > { %v2188_v47 = vpop.f32.mrb[16].mxu0 }
 0x334   : > { %v2193_v49 = vpop.f32.mrb[17].mxu0 }
 0x335   : > { %v1166_v51 = vpop.f32.mrb[2].mxu1 }
 0x336   : > { %v1583_v52 = vadd.f32 %v1166_v51, %v907_v12  ;;  %v1168_v53 = vpop.f32.mrb[3].mxu1 }
 0x337   : > { %v1584_v26 = vadd.f32 %v1168_v53, %v909_v13 }
 0x338   : > { %v1241_v27 = vadd.f32 %v1583_v52, %v2191_v48 }
 0x339   : > { %v1242_v56 = vadd.f32 %v1584_v26, %v2197_v50  ;;  %v1172_v54 = vpop.f32.mrb[4].mxu1 }
 0x33a   : > { %1257 = vst [vmem:[%s2201_s13] sm:$0xff] %v1241_v27  ;;  %v1585_v62 = vadd.f32 %v1172_v54, %v913_v19  ;;  %v1174_v55 = vpop.f32.mrb[5].mxu1 }
 0x33b   : > { %1258 = vst [vmem:[%s2201_s13 + $0x8] sm:$0xff] %v1242_v56  ;;  %v1586_v0 = vadd.f32 %v1174_v55, %v915_v20 }
 0x33c   : > { %v1243_v57 = vadd.f32 %v1585_v62, %v2191_v48 }
 0x33d   : > { %v1244_v38 = vadd.f32 %v1586_v0, %v2197_v50  ;;  %v1178_v58 = vpop.f32.mrb[6].mxu1 }
 0x33e   : > { %1259 = vst [vmem:[%s2201_s13 + $0x10] sm:$0xff] %v1243_v57  ;;  %v1587_v59 = vadd.f32 %v1178_v58, %v919_v36  ;;  %v1180_v21 = vpop.f32.mrb[7].mxu1 }
 0x33f   : > { %1260 = vst [vmem:[%s2201_s13 + $0x18] sm:$0xff] %v1244_v38  ;;  %v1588_v60 = vadd.f32 %v1180_v21, %v921_v37 }
 0x340   : > { %v1245_v61 = vadd.f32 %v1587_v59, %v2191_v48 }
 0x341   : > { %v1246_v63 = vadd.f32 %v1588_v60, %v2197_v50  ;;  %v1184_v2 = vpop.f32.mrb[8].mxu1 }
 0x342   : > { %1261 = vst [vmem:[%s2201_s13 + $0x20] sm:$0xff] %v1245_v61  ;;  %v1589_v3 = vadd.f32 %v1184_v2, %v925_v39  ;;  %v1186_v5 = vpop.f32.mrb[9].mxu1 }
 0x343   : > { %1262 = vst [vmem:[%s2201_s13 + $0x28] sm:$0xff] %v1246_v63  ;;  %v1590_v6 = vadd.f32 %v1186_v5, %v927_v40 }
 0x344   : > { %v1247_v7 = vadd.f32 %v1589_v3, %v2191_v48 }
 0x345   : > { %v1248_v8 = vadd.f32 %v1590_v6, %v2197_v50  ;;  %v1190_v11 = vpop.f32.mrb[10].mxu1 }
 0x346   : > { %1263 = vst [vmem:[%s2201_s13 + $0x30] sm:$0xff] %v1247_v7  ;;  %v1591_v14 = vadd.f32 %v1190_v11, %v931_v17  ;;  %v1192_v15 = vpop.f32.mrb[11].mxu1 }
 0x347   : > { %1264 = vst [vmem:[%s2201_s13 + $0x38] sm:$0xff] %v1248_v8  ;;  %v1592_v22 = vadd.f32 %v1192_v15, %v933_v41 }
 0x348   : > { %v1249_v23 = vadd.f32 %v1591_v14, %v2191_v48 }
 0x349   : > { %v1250_v44 = vadd.f32 %v1592_v22, %v2197_v50  ;;  %v1196_v24 = vpop.f32.mrb[12].mxu1 }
 0x34a   : > { %1265 = vst [vmem:[%s2201_s13 + $0x40] sm:$0xff] %v1249_v23  ;;  %v1593_v45 = vadd.f32 %v1196_v24, %v937_v25  ;;  %v1198_v28 = vpop.f32.mrb[13].mxu1 }
 0x34b   : > { %1266 = vst [vmem:[%s2201_s13 + $0x48] sm:$0xff] %v1250_v44  ;;  %v1594_v29 = vadd.f32 %v1198_v28, %v939_v18 }
 0x34c   : > { %v1251_v30 = vadd.f32 %v1593_v45, %v2191_v48 }
 0x34d   : > { %v1252_v9 = vadd.f32 %v1594_v29, %v2197_v50  ;;  %v1202_v10 = vpop.f32.mrb[14].mxu1 }
 0x34e   : > { %1267 = vst [vmem:[%s2201_s13 + $0x50] sm:$0xff] %v1251_v30  ;;  %v1595_v4 = vadd.f32 %v1202_v10, %v943_v42  ;;  %v1204_v31 = vpop.f32.mrb[15].mxu1 }
 0x34f   : > { %1268 = vst [vmem:[%s2201_s13 + $0x58] sm:$0xff] %v1252_v9  ;;  %v1596_v32 = vadd.f32 %v1204_v31, %v945_v43 }
 0x350   : > { %v1253_v33 = vadd.f32 %v1595_v4, %v2191_v48 }
 0x351   : > { %v1254_v34 = vadd.f32 %v1596_v32, %v2197_v50  ;;  %v1208_v35 = vpop.f32.mrb[16].mxu1 }
 0x352   : > { %1269 = vst [vmem:[%s2201_s13 + $0x60] sm:$0xff] %v1253_v33  ;;  %v1597_v16 = vadd.f32 %v1208_v35, %v2188_v47  ;;  %v1210_v12 = vpop.f32.mrb[17].mxu1 }
 0x353   : > { %1270 = vst [vmem:[%s2201_s13 + $0x68] sm:$0xff] %v1254_v34  ;;  %v1598_v13 = vadd.f32 %v1210_v12, %v2193_v49 }
 0x354   : > { %v1255_v19 = vadd.f32 %v1597_v16, %v2191_v48 }
 0x355   : > { %v1256_v20 = vadd.f32 %v1598_v13, %v2197_v50 }
 0x356   : > { %1271 = vst [vmem:[%s2201_s13 + $0x70] sm:$0xff] %v1255_v19 }
 0x357   : > { %1272 = vst [vmem:[%s2201_s13 + $0x78] sm:$0xff] %v1256_v20 }
 0x358   : > { %1748 = shalt.err (!%p1745_p7)
}
 0x359   : > { %s1749_s9 = scalar_lea.hbm %s2237_s16, 2048  ;;  %s1753_s29 = scalar_lea.hbm %s2293_s6, 4096 }
 0x35a   : > { %p1750_p8 = scmp.ne.s32.totalorder %s2237_s16, %s1749_s9  ;;  %p1754_p1 = scmp.lt.u32.totalorder %s2237_s16, %s2293_s6 }
 0x35b   : > { %p1755_p0 = scmp.lt.u32.totalorder %s1753_s29, %s1749_s9  ;;  %p1757_p6 = scmp.lt.u32.totalorder %s1749_s9, %s2237_s16 }
 0x35c   : > { %p1751_p11 = pnand %p1750_p8, %p2306_p9 }
 0x35d   : > { %p1756_p5 = por %p1755_p0, %p1754_p1 }
 0x35e   : > { %p1752_p13 = pneg %p1751_p11 }
 0x35f   : > { %p1758_p10 = por %p1757_p6, %p1756_p5 }
 0x361   : > { %p1759_p12 = pnand %p1758_p10, %p1752_p13 }
 0x363   : > { %1762 = shalt.err (!%p1759_p12)
}
 0x364   : > { %s1811_s11 = smov 256   ;;  %s1812_s14 = smov 16  }
 0x365   : > { %1619 = dma.vmem_to_hbm [thread:$0]  (%p2306_p9), %s2239_s12, 2048, %s2237_s16, %s2246_s25, %s1811_s11, %s1811_s11, %s1812_s14  }
 0x366 PF: > { %p1631_p2 = scmp.ge.s32.totalorder %s1801_s24, 2  ;;  %s1303_s15 = sand.u32 1, %s1789_s21  }
 0x367   : > { %p2307_p3 = scmp.ne.s32.totalorder %s2298_s8, 0  ;;  %s1304_s17 = scalar_lea.sflag [#allocation4], %s1303_s15 }
 0x369   : > { %p1626_p4 = pnand %p1631_p2, %p2307_p3 }
 0x36b   : > { %1784 = dma.done.wait (!%p1626_p4), %s1304_s17, 2048  }
 0x36c   : > { %1786 = vsyncadd (!%p1626_p4), %s1304_s17, 4294965248  ;;  %p17_p7 = scmp.ge.s32.totalorder %s1873_s27, 4   ;;  %s2308_s21 = smov %s1793_s22 }
 0x36d   : > { %s2309_s22 = smov %s1797_s23  ;;  %s2310_s23 = smov %s1884_s30 }
 0x36e   : > { %s2311_s24 = smov %s1873_s27  ;;  %19 = sbr.rel (!%p17_p7) target bundleno = 4 (0x4), region = 86 }
 0x375   :  { %1309 = vsyncpa [#allocation3], 1 }
 0x376   :  { %1311 = vsyncpa [#allocation3 + $0x1], 1 }
 0x377   :  { %1312 = vsyncpa [#allocation4], 1 }
 0x378   :  { %1314 = vsyncpa [#allocation4 + $0x1], 1 }

</bundles_post_ra>
